<compile_context>
chip_gen: v7x
topology: tpu7x:2x2x1
jax: 0.10.0
libtpu: 0.0.40
codegen_flags: <defaults>
</compile_context>

<pallas_src>
import jax
import jax.numpy as jnp
from jax.experimental import pallas as pl
from jax.experimental.pallas import tpu as pltpu


def _round_up(v, m):
    return -(-v // m) * m


def _cdiv(a, b):
    return -(-a // b)


def ffn_kernel(x_ref, wi_ref, bi_ref, wih_ref, bc_ref, wf_ref, bf_ref, out_ref):
    """One row-chunk of the zero-state 'RNN' (a 3-layer MLP on the MXU)."""
    w_dtype = wih_ref.dtype
    # initial Linear + ReLU
    z = jnp.maximum(
        jnp.dot(x_ref[...], wi_ref[...], preferred_element_type=jnp.float32)
        + bi_ref[...],
        0.0,
    )
    # RNN cell with h_{t-1} == 0:  relu(z @ W_ih^T + (b_ih + b_hh))
    h = jnp.maximum(
        jnp.dot(z.astype(w_dtype), wih_ref[...], preferred_element_type=jnp.float32)
        + bc_ref[...],
        0.0,
    )
    # final Linear -- store only the real A columns (no lane padding).
    out_ref[...] = (
        jnp.dot(h.astype(w_dtype), wf_ref[...], preferred_element_type=jnp.float32)
        + bf_ref[...]
    )


def prepare_params(params, dtype=jnp.float32):
    """One-time host-side weight preparation.  Call once and reuse.

    Transposes weights for row-major matmuls, folds b_ih + b_hh (the zero
    hidden state makes W_hh a no-op), and casts matmul operands to `dtype`
    (biases stay f32 so bias-add / ReLU math is exact).
    """
    return {
        "wi": jnp.asarray(params["w_initial"].T, dtype),                 # (Din, H)
        "bi": jnp.asarray(params["b_initial"], jnp.float32)[None, :],    # (1, H)
        "wih": jnp.asarray(params["w_ih"].T, dtype),                     # (H, H)
        "bc": jnp.asarray(params["b_ih"] + params["b_hh"], jnp.float32)[None, :],
        "wf": jnp.asarray(params["w_final"].T, dtype),                   # (H, A)
        "bf": jnp.asarray(params["b_final"], jnp.float32)[None, :],      # (1, A)
    }


def rnn_qnetwork_zero_state_forward(prepped, x, *, max_block_m=1024):
    """Batch-first forward matching RNNQNetworkZeroState.forward semantics."""
    if x.ndim < 3:
        x = x[None]                                       # unsqueeze(0)
    B, T, Din = x.shape
    H = prepped["wi"].shape[1]
    A = prepped["wf"].shape[1]
    in_dtype = prepped["wi"].dtype
    in_bpe = jnp.dtype(in_dtype).itemsize

    M = B * T

    # ---- block_m selection -------------------------------------------------
    # Big tiles for HBM-bound throughput, but at least 2 chunks when possible
    # so both v7x TensorCores are busy ("parallel" grid axis).
    if M <= 8:
        block_m = _round_up(max(M, 1), 8)                 # single tiny chunk
    elif M <= 2 * max_block_m:
        block_m = _round_up(_cdiv(M, 2), 8)               # exactly 2 chunks
    else:
        block_m = max_block_m

    # ---- explicit VMEM budget (keeps the large tile legal on all chips) ----
    def _vmem_need(bm):
        x_tile = bm * Din * in_bpe
        out_tile = bm * A * 4
        inter = 2 * bm * H * 4                            # z, h intermediates
        weights = (Din * H + H * H + H * A) * in_bpe + (2 * H + A) * 4
        # x/out double-buffered by the pipeline; weights double-buffered by
        # default BlockSpec behaviour (constant index_map, still 2 buffers).
        return 2 * (x_tile + out_tile) + 2 * weights + inter

    vmem_cap = 48 << 20                                   # headroom under v7x's 64 MiB
    while _vmem_need(block_m) > vmem_cap and block_m > 64:
        block_m = max(64, _round_up(block_m // 2, 8))

    M_pad = _round_up(M, block_m)
    grid = (M_pad // block_m,)

    # Flatten (B, T, Din) -> (M, Din), pad rows to the block multiple.
    x_flat = x.reshape(M, Din).astype(in_dtype)
    if M_pad != M:
        x_flat = jnp.pad(x_flat, ((0, M_pad - M), (0, 0)))

    flops = 2 * M_pad * (Din * H + H * H + H * A)
    bytes_accessed = (
        M_pad * Din * in_bpe
        + (Din * H + H * H + H * A) * in_bpe
        + (2 * H + A) * 4
        + M_pad * A * 4
    )
    vmem_limit = int(min(_vmem_need(block_m) + (2 << 20), 64 << 20))

    out_padded = pl.pallas_call(
        ffn_kernel,
        out_shape=jax.ShapeDtypeStruct((M_pad, A), jnp.float32),
        grid=grid,
        in_specs=[
            pl.BlockSpec((block_m, Din), lambda i: (i, 0)),   # x rows (pipelined)
            pl.BlockSpec((Din, H), lambda i: (0, 0)),         # W_init^T (resident)
            pl.BlockSpec((1, H), lambda i: (0, 0)),           # b_init
            pl.BlockSpec((H, H), lambda i: (0, 0)),           # W_ih^T
            pl.BlockSpec((1, H), lambda i: (0, 0)),           # b_ih + b_hh
            pl.BlockSpec((H, A), lambda i: (0, 0)),           # W_final^T (no padding)
            pl.BlockSpec((1, A), lambda i: (0, 0)),           # b_final
        ],
        out_specs=pl.BlockSpec((block_m, A), lambda i: (i, 0)),
        compiler_params=pltpu.CompilerParams(
            dimension_semantics=("parallel",),
            vmem_limit_bytes=vmem_limit,
        ),
        cost_estimate=pl.CostEstimate(
            flops=int(flops), transcendentals=0, bytes_accessed=int(bytes_accessed)
        ),
    )(x_flat, prepped["wi"], prepped["bi"], prepped["wih"], prepped["bc"],
      prepped["wf"], prepped["bf"])

    # Drop row padding, restore batch-first (B, T, A).
    return out_padded[:M].reshape(B, T, A)


def reference_forward(params, x):
    """Pure-JAX reference matching the PyTorch forward() exactly."""
    if x.ndim < 3:
        x = x[None]
    z = jax.nn.relu(x @ params["w_initial"].T + params["b_initial"])
    h = jax.nn.relu(z @ params["w_ih"].T + params["b_ih"] + params["b_hh"])
    return h @ params["w_final"].T + params["b_final"]


def init_params(key, input_size, action_size, hidden_size):
    """PyTorch-style uniform(-1/sqrt(fan_in), 1/sqrt(fan_in)) init."""
    ks = jax.random.split(key, 8)

    def u(k, shape, fan_in):
        bound = 1.0 / jnp.sqrt(fan_in)
        return jax.random.uniform(k, shape, jnp.float32, -bound, bound)

    H, A, D = hidden_size, action_size, input_size
    return {
        "w_initial": u(ks[0], (H, D), D),
        "b_initial": u(ks[1], (H,), D),
        "w_ih":      u(ks[2], (H, H), H),
        "b_ih":      u(ks[3], (H,), H),
        "w_hh":      u(ks[4], (H, H), H),   # present in the module; unused (zero state)
        "b_hh":      u(ks[5], (H,), H),
        "w_final":   u(ks[6], (A, H), H),
        "b_final":   u(ks[7], (A,), H),
    }


if __name__ == "__main__":
    B, T = 2, 8
    input_size, hidden_size, action_size = 16, 32, 4

    key = jax.random.PRNGKey(0)
    pkey, xkey = jax.random.split(key)
    params = init_params(pkey, input_size, action_size, hidden_size)
    x = jax.random.normal(xkey, (B, T, input_size), jnp.float32)

    # One-time weight preparation (cache and reuse across forward calls).
    prepped = prepare_params(params, dtype=jnp.float32)

    out = rnn_qnetwork_zero_state_forward(prepped, x)
    out = jax.block_until_ready(out)

    ref = reference_forward(params, x)
    assert out.shape == (B, T, action_size)
    assert jnp.allclose(out, ref, atol=1e-4, rtol=1e-4), "mismatch vs reference"

    print("KERNEL_OK")
</pallas_src>

<mosaic_0001>
module attributes {stable_mosaic.version = 11 : i64} {
  func.func @ffn_kernel(%arg0: i32, %arg1: memref<8x16xf32, #tpu.memory_space<vmem>>, %arg2: memref<16x32xf32, #tpu.memory_space<vmem>>, %arg3: memref<1x32xf32, #tpu.memory_space<vmem>>, %arg4: memref<32x32xf32, #tpu.memory_space<vmem>>, %arg5: memref<1x32xf32, #tpu.memory_space<vmem>>, %arg6: memref<32x4xf32, #tpu.memory_space<vmem>>, %arg7: memref<1x4xf32, #tpu.memory_space<vmem>>, %arg8: memref<8x4xf32, #tpu.memory_space<vmem>>) attributes {dimension_semantics = [#tpu.dimension_semantics<parallel>], iteration_bounds = array<i64: 2>, scalar_prefetch = 0 : i64, scratch_operands = 0 : i64, tpu.core_type = #tpu.core_type<tc>, window_params = [{transform_indices = @transform_0, window_bounds = array<i64: 8, 16>}, {pipeline_mode = #tpu.pipeline_mode<synchronous>, transform_indices = @transform_1, window_bounds = array<i64: 16, 32>}, {pipeline_mode = #tpu.pipeline_mode<synchronous>, transform_indices = @transform_2, window_bounds = array<i64: 1, 32>}, {pipeline_mode = #tpu.pipeline_mode<synchronous>, transform_indices = @transform_3, window_bounds = array<i64: 32, 32>}, {pipeline_mode = #tpu.pipeline_mode<synchronous>, transform_indices = @transform_4, window_bounds = array<i64: 1, 32>}, {pipeline_mode = #tpu.pipeline_mode<synchronous>, transform_indices = @transform_5, window_bounds = array<i64: 32, 4>}, {pipeline_mode = #tpu.pipeline_mode<synchronous>, transform_indices = @transform_6, window_bounds = array<i64: 1, 4>}, {transform_indices = @transform_7, window_bounds = array<i64: 8, 4>}]} {
    %c0 = arith.constant 0 : index
    %c0_0 = arith.constant 0 : index
    %0 = vector.load %arg1[%c0, %c0_0] : memref<8x16xf32, #tpu.memory_space<vmem>>, vector<8x16xf32>
    %c0_1 = arith.constant 0 : index
    %c0_2 = arith.constant 0 : index
    %1 = vector.load %arg2[%c0_1, %c0_2] : memref<16x32xf32, #tpu.memory_space<vmem>>, vector<16x32xf32>
    %cst = arith.constant dense<0.000000e+00> : vector<8x32xf32>
    %2 = tpu.matmul %0, %1, %cst {dimension_numbers = #tpu.dot_dimension_numbers<[1], [0], [0], [1], [0, 0, 1, 1], [], []>} : vector<8x16xf32>, vector<16x32xf32>, vector<8x32xf32> -> vector<8x32xf32>
    %c0_3 = arith.constant 0 : index
    %c0_4 = arith.constant 0 : index
    %3 = vector.load %arg3[%c0_3, %c0_4] : memref<1x32xf32, #tpu.memory_space<vmem>>, vector<1x32xf32>
    %4 = vector.broadcast %3 : vector<1x32xf32> to vector<8x32xf32>
    %5 = arith.addf %2, %4 : vector<8x32xf32>
    %cst_5 = arith.constant 0.000000e+00 : f32
    %6 = vector.broadcast %cst_5 : f32 to vector<8x32xf32>
    %7 = arith.maximumf %5, %6 : vector<8x32xf32>
    %c0_6 = arith.constant 0 : index
    %c0_7 = arith.constant 0 : index
    %8 = vector.load %arg4[%c0_6, %c0_7] : memref<32x32xf32, #tpu.memory_space<vmem>>, vector<32x32xf32>
    %cst_8 = arith.constant dense<0.000000e+00> : vector<8x32xf32>
    %9 = tpu.matmul %7, %8, %cst_8 {dimension_numbers = #tpu.dot_dimension_numbers<[1], [0], [0], [1], [0, 0, 1, 1], [], []>} : vector<8x32xf32>, vector<32x32xf32>, vector<8x32xf32> -> vector<8x32xf32>
    %c0_9 = arith.constant 0 : index
    %c0_10 = arith.constant 0 : index
    %10 = vector.load %arg5[%c0_9, %c0_10] : memref<1x32xf32, #tpu.memory_space<vmem>>, vector<1x32xf32>
    %11 = vector.broadcast %10 : vector<1x32xf32> to vector<8x32xf32>
    %12 = arith.addf %9, %11 : vector<8x32xf32>
    %cst_11 = arith.constant 0.000000e+00 : f32
    %13 = vector.broadcast %cst_11 : f32 to vector<8x32xf32>
    %14 = arith.maximumf %12, %13 : vector<8x32xf32>
    %c0_12 = arith.constant 0 : index
    %c0_13 = arith.constant 0 : index
    %15 = vector.load %arg6[%c0_12, %c0_13] : memref<32x4xf32, #tpu.memory_space<vmem>>, vector<32x4xf32>
    %cst_14 = arith.constant dense<0.000000e+00> : vector<8x4xf32>
    %16 = tpu.matmul %14, %15, %cst_14 {dimension_numbers = #tpu.dot_dimension_numbers<[1], [0], [0], [1], [0, 0, 1, 1], [], []>} : vector<8x32xf32>, vector<32x4xf32>, vector<8x4xf32> -> vector<8x4xf32>
    %c0_15 = arith.constant 0 : index
    %c0_16 = arith.constant 0 : index
    %17 = vector.load %arg7[%c0_15, %c0_16] : memref<1x4xf32, #tpu.memory_space<vmem>>, vector<1x4xf32>
    %18 = vector.broadcast %17 : vector<1x4xf32> to vector<8x4xf32>
    %19 = arith.addf %16, %18 : vector<8x4xf32>
    %c0_17 = arith.constant 0 : index
    %c0_18 = arith.constant 0 : index
    %20 = vector.load %arg8[%c0_17, %c0_18] : memref<8x4xf32, #tpu.memory_space<vmem>>, vector<8x4xf32>
    tpu.vector_store %arg8[%c0_17, %c0_18], %19 {strides = array<i32>} : memref<8x4xf32, #tpu.memory_space<vmem>>, vector<8x4xf32>,
    return
  }
  func.func @transform_0(%arg0: i32) -> (i32, i32) {
    %c0_i32 = arith.constant 0 : i32
    %c0_i32_0 = arith.constant 0 : i32
    return %arg0, %c0_i32 : i32, i32
  }
  func.func @transform_1(%arg0: i32) -> (i32, i32) {
    %c0_i32 = arith.constant 0 : i32
    %c0_i32_0 = arith.constant 0 : i32
    %c0_i32_1 = arith.constant 0 : i32
    return %c0_i32, %c0_i32_0 : i32, i32
  }
  func.func @transform_2(%arg0: i32) -> (i32, i32) {
    %c0_i32 = arith.constant 0 : i32
    %c0_i32_0 = arith.constant 0 : i32
    %c0_i32_1 = arith.constant 0 : i32
    return %c0_i32, %c0_i32_0 : i32, i32
  }
  func.func @transform_3(%arg0: i32) -> (i32, i32) {
    %c0_i32 = arith.constant 0 : i32
    %c0_i32_0 = arith.constant 0 : i32
    %c0_i32_1 = arith.constant 0 : i32
    return %c0_i32, %c0_i32_0 : i32, i32
  }
  func.func @transform_4(%arg0: i32) -> (i32, i32) {
    %c0_i32 = arith.constant 0 : i32
    %c0_i32_0 = arith.constant 0 : i32
    %c0_i32_1 = arith.constant 0 : i32
    return %c0_i32, %c0_i32_0 : i32, i32
  }
  func.func @transform_5(%arg0: i32) -> (i32, i32) {
    %c0_i32 = arith.constant 0 : i32
    %c0_i32_0 = arith.constant 0 : i32
    %c0_i32_1 = arith.constant 0 : i32
    return %c0_i32, %c0_i32_0 : i32, i32
  }
  func.func @transform_6(%arg0: i32) -> (i32, i32) {
    %c0_i32 = arith.constant 0 : i32
    %c0_i32_0 = arith.constant 0 : i32
    %c0_i32_1 = arith.constant 0 : i32
    return %c0_i32, %c0_i32_0 : i32, i32
  }
  func.func @transform_7(%arg0: i32) -> (i32, i32) {
    %c0_i32 = arith.constant 0 : i32
    %c0_i32_0 = arith.constant 0 : i32
    return %arg0, %c0_i32 : i32, i32
  }
}

</mosaic_0001>

<bundles_post_ra>
// kernel: tpu_custom_call.1
= control target key start
LH: loop header
LB: loop body
LE: loop exit
PB: predicated region body
PF: predicated region fallthrough
CT: control target
= control target key end

     0   :  { %12 = vsyncpa [#allocation3], 0  ;;  %s1091_s0 = inlined_call_operand.hbm [shape: f32[16,16], index: 0, kind: input, shape index: {}]   ;;  %s1092_s1 = inlined_call_operand.hbm [shape: f32[16,32], index: 1, kind: input, shape index: {}]   ;;  %s1093_s2 = inlined_call_operand.vmem [shape: f32[1,32], index: 2, kind: input, shape index: {}]   ;;  %s1094_s3 = inlined_call_operand.vmem [shape: f32[32,32], index: 3, kind: input, shape index: {}]   ;;  %s1095_s4 = inlined_call_operand.vmem [shape: f32[1,32], index: 4, kind: input, shape index: {}]   ;;  %s1096_s5 = inlined_call_operand.vmem [shape: f32[32,4], index: 5, kind: input, shape index: {}]   ;;  %s1097_s6 = inlined_call_operand.vmem [shape: f32[1,4], index: 6, kind: input, shape index: {}]   ;;  %s1098_s7 = inlined_call_operand.vmem [shape: f32[16,4], index: 7, kind: output, shape index: {}]  }
   0x1   :  { %14 = vsyncpa [#allocation3 + $0x1], 0 }
   0x2   :  { %15 = vsyncpa [#allocation5], 0  ;;  %s916_s24 = smov 0   ;;  %s918_s25 = smov 0  }
   0x3   :  { %s920_s26 = smov 0   ;;  %s922_s27 = smov 0  }
   0x4 LB: > { %s935_s28 = sadd.s32 4294967295, %s867_s27   ;;  %p41_p0 = scmp.ne.s32.totalorder %s859_s25, %s855_s24  ;;  %s867_s27 = sphi %s922_s27, %s1113_s27   ;;  %s863_s26 = sphi %s920_s26, %s1112_s26   ;;  %s859_s25 = sphi %s918_s25, %s1111_s25   ;;  %s855_s24 = sphi %s916_s24, %s1110_s24  }
   0x5   : > { %p1099_p1 = scmp.eq.s32.totalorder %s935_s28, 0  ;;  %p642_p2 = scmp.ge.s32.totalorder %s867_s27, 1 }
   0x6   : > { %p204_p3 = scmp.lt.s32.totalorder %s867_s27, 3  ;;  %s869_s8 = smov [#allocation4]  }
   0x7   : > { %p943_p4 = por %p1099_p1, %p41_p0  ;;  %s216_s9 = sshll.u32 %s869_s8, 4  ;;  %s217_s9 = int_to_ptr.vmem [resolvable:$true] %s216_s9 }
   0x8   : > { %p947_p5 = pnand %p642_p2, %p204_p3  ;;  %s960_s11 = sadd.s32 1, %s867_s27  }
   0x9   : > { %s1102_s29 = scalar_select %p943_p4, 1, 0 }
   0xa   : > { %s1103_s30 = scalar_select %p947_p5, 1, 0 }
   0xb   : > { %p722_p6 = pneg %p947_p5  ;;  %s28_s12 = sadd.s32 1, %s863_s26 }
   0xc   : > { %s25_s13 = ssub.s32 %s867_s27, %s960_s11  ;;  %s771_s16 = scalar_lea.hbm %s1092_s1, 256 }
   0xd   : > { %p955_p7 = pnand %p722_p6, %p1099_p1  ;;  %p772_p8 = scmp.ne.s32.totalorder %s1092_s1, %s771_s16 }
   0xe   : > { %p778_p12 = scmp.lt.u32.totalorder %s771_s16, %s1092_s1 }
   0xf   : > { %p773_p9 = pneg %p955_p7 }
  0x11   : > { %p774_p10 = pnand %p773_p9, %p772_p8 }
  0x13   : > { %p775_p11 = pneg %p774_p10 }
  0x15   : > { %p780_p13 = pnand %p778_p12, %p775_p11 }
  0x17   : > { %783 = shalt.err (!%p780_p13)
}
  0x18   : > { %s784_s21 = scalar_lea.vmem %s217_s9, 256  ;;  %p792_p6 = scmp.lt.s32.totalorder %s217_s9, %s217_s9 }
  0x19   : > { %p785_p0 = scmp.ne.s32.totalorder %s217_s9, %s784_s21  ;;  %p793_p1 = scmp.lt.s32.totalorder %s784_s21, %s784_s21 }
  0x1b   : > { %p787_p2 = pnand %p785_p0, %p773_p9  ;;  %p794_p4 = por %p793_p1, %p792_p6 }
  0x1d   : > { %p788_p3 = pneg %p787_p2 }
  0x1f   : > { %p795_p5 = pnand %p794_p4, %p788_p3 }
  0x21   : > { %798 = shalt.err (!%p795_p5)
}
  0x22   : > { %s870_s22 = smov 128   ;;  %s871_s23 = smov 8  }
  0x23   : > { %725 = dma.hbm_to_vmem [thread:$0]  (!%p955_p7), %s1092_s1, 256, %s217_s9, [#allocation5], %s870_s22, %s870_s22, %s871_s23  }
  0x24   : > { %p26_p8 = scmp.eq.s32.totalorder %s25_s13, 0  ;;  %p35_p9 = scmp.ne.s32.totalorder %s863_s26, %s859_s25 }
  0x25   : > { %p36_p1 = scmp.eq.s32.totalorder %s867_s27, 0  ;;  %p731_p4 = scmp.lt.s32.totalorder %s867_s27, 2 }
  0x26   : > { %s986_s14 = scalar_select %p26_p8, %s863_s26, %s28_s12  }
  0x27   : > { %p37_p5 = por %p36_p1, %p35_p9  ;;  %s245_s15 = sand.u32 1, %s863_s26  }
  0x28   : > { %s645_s16 = sshll.u32 %s245_s15, 3  ;;  %s646_s17 = sshll.u32 %s867_s27, 7 }
  0x29   : > { %s993_s20 = scalar_lea.hbm %s1091_s0, %s646_s17  ;;  %s249_s9 = scalar_lea.vmem [#allocation2], %s645_s16 }
  0x2a   : > { %s256_s10 = sshll.u32 %s249_s9, 4  ;;  %p997_p7 = pnand %p731_p4, %p37_p5  ;;  %s995_s10 = int_to_ptr.vmem [resolvable:$true] %s256_s10 }
  0x2b   : > { %s246_s27 = scalar_lea.sflag [#allocation3], %s245_s15  ;;  %s799_s13 = scalar_lea.hbm %s993_s20, 128 }
  0x2c   : > { %p800_p10 = scmp.ne.s32.totalorder %s993_s20, %s799_s13  ;;  %p801_p11 = pneg %p997_p7 }
  0x2d   : > { %s804_s23 = scalar_lea.hbm %s1091_s0, 256  ;;  %p805_p0 = scmp.lt.u32.totalorder %s993_s20, %s1091_s0 }
  0x2e   : > { %p802_p12 = pnand %p801_p11, %p800_p10  ;;  %p806_p2 = scmp.lt.u32.totalorder %s804_s23, %s799_s13 }
  0x2f   : > { %p808_p6 = scmp.lt.u32.totalorder %s799_s13, %s993_s20 }
  0x30   : > { %p803_p13 = pneg %p802_p12  ;;  %p807_p3 = por %p806_p2, %p805_p0 }
  0x32   : > { %p809_p8 = por %p808_p6, %p807_p3 }
  0x34   : > { %p810_p9 = pnand %p809_p8, %p803_p13 }
  0x36   : > { %813 = shalt.err (!%p810_p9)
}
  0x37   : > { %s814_s15 = scalar_lea.vmem %s995_s10, 128  ;;  %s872_s16 = smov [#allocation2]  }
  0x38   : > { %p815_p1 = scmp.ne.s32.totalorder %s995_s10, %s814_s15  ;;  %s819_s17 = sshll.u32 %s872_s16, 4  ;;  %s820_s17 = int_to_ptr.vmem [resolvable:$false] %s819_s17 }
  0x39   : > { %s821_s18 = scalar_lea.vmem %s820_s17, 256  ;;  %p822_p10 = scmp.lt.s32.totalorder %s995_s10, %s820_s17 }
  0x3a   : > { %p817_p4 = pnand %p815_p1, %p801_p11  ;;  %p823_p12 = scmp.lt.s32.totalorder %s821_s18, %s814_s15 }
  0x3c   : > { %p818_p5 = pneg %p817_p4  ;;  %p824_p0 = por %p823_p12, %p822_p10 }
  0x3e   : > { %p825_p2 = pnand %p824_p0, %p818_p5 }
  0x40   : > { %828 = shalt.err (!%p825_p2)
}
  0x41   : > { %729 = dma.hbm_to_vmem [thread:$0]  (!%p997_p7), %s993_s20, 128, %s995_s10, %s246_s27  }
  0x42   : > { %p1106_p13 = scmp.ne.s32.totalorder %s1103_s30, 0 }
  0x43   : > { %s267_s19 = sand.u32 (!%p1106_p13), 1, %s859_s25   ;;  %p1107_p11 = scmp.ne.s32.totalorder (!%p1106_p13), %s1102_s29, 0 }
  0x44   : > { %265 = sbr.rel (%p1106_p13) target bundleno = 732 (0x2dc), region = 48  ;;  %s648_s9 = sshll.u32 (!%p1106_p13), %s267_s19, 3 }
  0x45   : > { %s268_s13 = scalar_lea.sflag (!%p1106_p13), [#allocation3], %s267_s19  ;;  %s271_s21 = scalar_lea.vmem (!%p1106_p13), [#allocation2], %s648_s9 }
  0x4b   : > { %846 = dma.done.wait (%p1107_p11), %s268_s13, 128  }
  0x4c   : > { %848 = vsyncadd (%p1107_p11), %s268_s13, 4294967168  ;;  %p1108_p3 = scmp.eq.s32.totalorder %s935_s28, 0 }
  0x4e   : > { %850 = dma.done.wait (%p1108_p3), [#allocation5], 256   ;;  %p1109_p6 = pmov %p1108_p3 }
  0x4f   : > { %v873_v0 = vmov 0.0|0.0   ;;  %vm874_vm0 = vmmov 0   ;;  %v875_v1 = vmov 0.0   ;;  %v310_v2 = vld [vmem:[#allocation4] sm:$0xff]  ;;  %v311_v3 = vld [vmem:[#allocation4 + $0x8] sm:$0xff]  ;;  %v394_v5 = vld [vmem:[%s1094_s3] sm:$0xff] }
  0x50   : > { %852 = vsyncadd (%p1109_p6), [#allocation5], 4294967040  ;;  %701 = vmatprep.subr.bf16.mxu0 %v873_v0  ;;  %676 = vmatprep.mubr.msk.f32.mxu0 %vm874_vm0, %v875_v1  ;;  %v702_v4 = vpack.c.bf16 %v311_v3, %v310_v2  ;;  %v395_v6 = vld [vmem:[%s1094_s3 + $0x8] sm:$0xff]  ;;  %vm319_vm1 = vcmask 130048   ;;  %v396_v9 = vld [vmem:[%s1094_s3 + $0x10] sm:$0xff]  ;;  %vm405_vm2 = vcmask 261120  }
  0x51   : > { %704 = vmatprep.subr.bf16.mxu1 %v873_v0  ;;  %687 = vmatprep.mubr.msk.f32.mxu1 %vm874_vm0, %v875_v1  ;;  %v705_v7 = vpack.c.bf16 %v395_v6, %v394_v5  ;;  %v309_v8 = vld [vmem:[%s271_s21] sm:$0xff]  ;;  %v397_v10 = vld [vmem:[%s1094_s3 + $0x18] sm:$0xff]  ;;  %v482_v20 = vld [vmem:[%s1096_s5 + $0x10] sm:$0xff]  ;;  %p305_p7 = scmp.lt.s32.totalorder %s935_s28, 1  ;;  %vm564_vm3 = vcmask 31744  }
  0x52   : > { %703 = vmatpush3.bf16.msra.mxu0 %v702_v4  ;;  %v708_v11 = vpack.c.bf16 %v397_v10, %v396_v9  ;;  %v480_v12 = vld [vmem:[%s1096_s5] sm:$0xff]  ;;  %v481_v13 = vld [vmem:[%s1096_s5 + $0x8] sm:$0xff]  ;;  %v483_v21 = vld [vmem:[%s1096_s5 + $0x18] sm:$0xff] }
  0x53   : > { %706 = vmatpush3.bf16.msra.mxu1 %v705_v7  ;;  %710 = vmatprep.subr.bf16.mxu0 %v873_v0  ;;  %v711_v14 = vpack.c.bf16 %v481_v13, %v480_v12  ;;  %v651_v15 = vld [vmem:[%s1093_s2] ss:$0 sm:$0xff]  ;;  %v714_v22 = vpack.c.bf16 %v483_v21, %v482_v20  ;;  %s1115_s28 = smov (!%p305_p7, %s935_s28), 1 }
  0x54   : > { %707 = vmatprep.subr.bf16.mxu1 %v873_v0  ;;  %v653_v23 = vld [vmem:[%s1095_s4] ss:$0 sm:$0xff]  ;;  %s650_s20 = sshll.u32 %s1115_s28, 3 }
  0x55   : > { %677 = vmatmul.mubr.msk.f32.vlgmr.msra.gmra.mrb[0].mxu0 %vm319_vm1, %v309_v8  ;;  %v655_v28 = vld [vmem:[%s1097_s6] ss:$0 sm:$0xff]  ;;  %s308_s23 = scalar_lea.vmem %s1098_s7, %s650_s20 }
  0x56   : > { %698 = vmatprep.mubr.msk.f32.mxu0 %vm874_vm0, %v875_v1  ;;  %712 = vmatpush3.bf16.msra.mxu0 %v711_v14 }
  0x57   : > { %709 = vmatpush3.bf16.msra.mxu1 %v708_v11  ;;  %713 = vmatprep.subr.bf16.mxu0 %v873_v0 }
  0x5a   : > { %715 = vmatpush3.bf16.msra.mxu0 %v714_v22 }
 0x128   : > { %v389_v16 = vpop.f32.mrb[0].mxu0 }
 0x129   : > { %v390_v17 = vadd.f32 %v651_v15, %v389_v16  ;;  %v678_v18 = vpop.f32.mrb[1].mxu0 }
 0x12b   : > { %v393_v19 = vmax.f32 %v390_v17, 0.0 }
 0x12d   : > { %688 = vmatmul.mubr.msk.f32.vlgmr.msra.gmra.mrb[0].mxu1 %vm405_vm2, %v393_v19 }
 0x200   : > { %v475_v24 = vpop.f32.mrb[0].mxu1 }
 0x201   : > { %v476_v25 = vadd.f32 %v653_v23, %v475_v24  ;;  %v689_v26 = vpop.f32.mrb[1].mxu1 }
 0x203   : > { %v479_v27 = vmax.f32 %v476_v25, 0.0 }
 0x205   : > { %699 = vmatmul.mubr.msk.f32.vlgmr.msra.gmra.mrb[2].mxu0 %vm405_vm2, %v479_v27 }
 0x2d8   : > { %v560_v29 = vpop.f32.mrb[2].mxu0 }
 0x2d9   : > { %v561_v30 = vadd.f32 %v655_v28, %v560_v29  ;;  %v700_v31 = vpop.f32.mrb[3].mxu0 }
 0x2db   : > { %565 = vst.msk [vmem:[%s308_s23] sm:$0xff] %vm564_vm3, %v561_v30 }
 0x2dc PF: > { %p18_p8 = scmp.ge.s32.totalorder %s960_s11, 4   ;;  %s1110_s24 = smov %s859_s25 }
 0x2dd   : > { %s1111_s25 = smov %s863_s26  ;;  %s1112_s26 = smov %s986_s14 }
 0x2de   : > { %s1113_s27 = smov %s960_s11  ;;  %20 = sbr.rel (!%p18_p8) target bundleno = 4 (0x4), region = 92 }
 0x2e5   :  { %585 = vsyncpa [#allocation3], 1 }
 0x2e6   :  { %587 = vsyncpa [#allocation3 + $0x1], 1 }
 0x2e7   :  { %588 = vsyncpa [#allocation5], 1 }

</bundles_post_ra>
